<compile_context>
chip_gen: v6e
topology: v6e:2x2x1
jax: 0.10.0
libtpu: 0.0.40
codegen_flags: <defaults>
</compile_context>

<pallas_src>
import functools

import jax
import jax.numpy as jnp
from jax.experimental import pallas as pl
from jax.experimental.pallas import tpu as pltpu

TRUNK = 200          # shared trunk width  (nn.Linear(state_shape, 200))
TRUNK_PAD = 256      # trunk padded to a clean 2x128-lane tile
STREAM = 512         # per-stream hidden width
FUSED = 2 * STREAM   # value|advantage streams fused side by side
QPAD = 128           # lane-padded head / output width


def _round_up(n, m):
    return (n + m - 1) // m * m


# ---------------------------------------------------------------------------
# Kernel: q = relu(relu(x@W1+b1) @ [Wv1|Wa1] + [bv1|ba1]) @ Wh + bh
# (Wh / bh already have the dueling mean folded in at pack time.)
# ---------------------------------------------------------------------------
def _dqn_kernel(x_ref, wmain_ref, whead_ref, q_ref, *,
                s_pad, r_b1, r_ws, r_bs, r_bh):
    x = x_ref[...]                                                   # (TB, 16) bf16

    # shared trunk: relu(x @ W1 + b1)   -- W1 zero-padded to 256 cols
    w1 = wmain_ref[0:s_pad, 0:TRUNK_PAD]                             # (16, 256)
    b1 = wmain_ref[r_b1:r_b1 + 1, 0:TRUNK_PAD].astype(jnp.float32)   # (1, 256)
    h = jnp.dot(x, w1, preferred_element_type=jnp.float32) + b1
    h = jnp.maximum(h, 0.0).astype(x.dtype)                          # (TB, 256)

    # fused value|advantage first layers: relu(h @ [Wv1|Wa1] + [bv1|ba1])
    ws = wmain_ref[r_ws:r_ws + TRUNK_PAD, :]                         # (256, 1024)
    bs = wmain_ref[r_bs:r_bs + 1, :].astype(jnp.float32)             # (1, 1024)
    hva = jnp.dot(h, ws, preferred_element_type=jnp.float32) + bs
    hva = jnp.maximum(hva, 0.0).astype(x.dtype)                      # (TB, 1024)

    # fused head with dueling combine folded into the weights (128-lane dense)
    wh = whead_ref[0:r_bh, :]                                        # (1024, 128)
    bh = whead_ref[r_bh:r_bh + 1, :].astype(jnp.float32)             # (1, 128)
    q_ref[...] = jnp.dot(hva, wh, preferred_element_type=jnp.float32) + bh


# ---------------------------------------------------------------------------
# Wrapper
# ---------------------------------------------------------------------------
def _choose_tile(b):
    # small batches: one tile, padded up to a bf16 sublane multiple
    if b <= 256:
        return _round_up(max(b, 16), 16)
    # large batches: fat tiles to amortize per-grid-step overhead, but keep
    # >=2 steps so v7x's second TensorCore gets a share of the batch.
    for tb in (1024, 512, 256):
        if b >= 2 * tb:
            return tb
    return 256


def dqn_forward(x, packed_main, packed_head, meta):
    B, S = x.shape
    assert S == meta["state_shape"], "input feature dim does not match packed params"
    s_pad = meta["s_pad"]
    assert s_pad == _round_up(max(S, 1), 16), "meta['s_pad'] inconsistent with input"
    n_actions = meta["n_actions"]

    tb = _choose_tile(B)
    # pad the batch only to the next sublane multiple (<=15 extra rows); the
    # ragged last grid tile is masked by Pallas at the grid edge.
    b_pad = _round_up(max(B, tb), 16) if B <= tb else _round_up(B, 16)

    xq = jnp.pad(x.astype(packed_main.dtype), ((0, b_pad - B), (0, s_pad - S)))

    kernel = functools.partial(
        _dqn_kernel,
        s_pad=s_pad, r_b1=meta["r_b1"], r_ws=meta["r_ws"],
        r_bs=meta["r_bs"], r_bh=meta["r_bh"])

    q_pad = pl.pallas_call(
        kernel,
        out_shape=jax.ShapeDtypeStruct((b_pad, QPAD), jnp.float32),
        grid=(pl.cdiv(b_pad, tb),),
        in_specs=[
            pl.BlockSpec((tb, s_pad), lambda i: (i, 0)),             # batch tile
            pl.BlockSpec(packed_main.shape, lambda i: (0, 0)),       # resident weights
            pl.BlockSpec(packed_head.shape, lambda i: (0, 0)),       # resident head
        ],
        out_specs=pl.BlockSpec((tb, QPAD), lambda i: (i, 0)),
        compiler_params=pltpu.CompilerParams(
            dimension_semantics=("parallel",),
            vmem_limit_bytes=32 * 1024 * 1024),
    )(xq, packed_main, packed_head)
    return q_pad[:B, :n_actions]


# ---------------------------------------------------------------------------
# Parameter packing: 10 arrays -> 2 bf16 buffers (dueling mean folded in)
# ---------------------------------------------------------------------------
def pack_params(params, state_shape, n_actions, dtype=jnp.bfloat16):
    (w1, b1, wv1, bv1, wv2, bv2, wa1, ba1, wa2, ba2) = params

    s_pad = _round_up(max(state_shape, 1), 16)    # bf16 sublane tile (16)
    r_b1 = s_pad                                  # 16
    r_ws = _round_up(r_b1 + 1, 16)                # 32
    r_bs = r_ws + TRUNK_PAD                       # 288
    n_rows = _round_up(r_bs + 1, 16)              # 304

    main = jnp.zeros((n_rows, FUSED), jnp.float32)
    main = main.at[0:state_shape, 0:TRUNK].set(w1)                   # cols 200:256 stay 0
    main = main.at[r_b1, 0:TRUNK].set(b1.reshape(-1))
    main = main.at[r_ws:r_ws + TRUNK, :].set(jnp.concatenate([wv1, wa1], axis=1))
    main = main.at[r_bs, :].set(jnp.concatenate([bv1, ba1], axis=1).reshape(-1))

    # Fold the dueling combine into the head (in f32, before the bf16 cast):
    #   Q_j = V + A_j - mean_k A_k
    #       = [h_v|h_a] @ [wv2 ; wa2[:,j] - mean_k wa2[:,k]] + (bv2 + ba2[j] - mean ba2)
    wa2c = wa2 - jnp.mean(wa2, axis=1, keepdims=True)                # (512, A)
    ba2c = ba2 - jnp.mean(ba2)                                       # (1, A)

    r_bh = FUSED                                  # 1024
    head_rows = _round_up(r_bh + 1, 16)           # 1040
    head = jnp.zeros((head_rows, QPAD), jnp.float32)
    head = head.at[0:STREAM, 0:n_actions].set(
        jnp.broadcast_to(wv2, (STREAM, n_actions)))                  # value part
    head = head.at[STREAM:FUSED, 0:n_actions].set(wa2c)              # centered advantage
    head = head.at[r_bh, 0:n_actions].set((bv2.reshape(()) + ba2c).reshape(-1))

    meta = dict(state_shape=state_shape, s_pad=s_pad, r_b1=r_b1, r_ws=r_ws,
                r_bs=r_bs, r_bh=r_bh, n_actions=n_actions)
    return main.astype(dtype), head.astype(dtype), meta


# ---------------------------------------------------------------------------
# Init (matches the PyTorch module: xavier_uniform weights, default bias init)
# ---------------------------------------------------------------------------
def xavier_uniform(key, fan_in, fan_out):
    limit = jnp.sqrt(6.0 / (fan_in + fan_out))
    return jax.random.uniform(key, (fan_in, fan_out), jnp.float32, -limit, limit)


def bias_init(key, fan_in, fan_out):
    bound = 1.0 / jnp.sqrt(jnp.float32(fan_in))
    return jax.random.uniform(key, (1, fan_out), jnp.float32, -bound, bound)


def init_dqn_params(key, state_shape, n_actions):
    keys = jax.random.split(key, 10)
    w1 = xavier_uniform(keys[0], state_shape, TRUNK)
    b1 = bias_init(keys[1], state_shape, TRUNK)
    wv1 = xavier_uniform(keys[2], TRUNK, STREAM)
    bv1 = bias_init(keys[3], TRUNK, STREAM)
    wv2 = xavier_uniform(keys[4], STREAM, 1)
    bv2 = bias_init(keys[5], STREAM, 1)
    wa1 = xavier_uniform(keys[6], TRUNK, STREAM)
    ba1 = bias_init(keys[7], TRUNK, STREAM)
    wa2 = xavier_uniform(keys[8], STREAM, n_actions)
    ba2 = bias_init(keys[9], STREAM, n_actions)
    return (w1, b1, wv1, bv1, wv2, bv2, wa1, ba1, wa2, ba2)


# ---------------------------------------------------------------------------
# References
# ---------------------------------------------------------------------------
def dqn_reference_f32(x, params):
    """Original full-f32 PyTorch-equivalent forward."""
    (w1, b1, wv1, bv1, wv2, bv2, wa1, ba1, wa2, ba2) = params
    h = jnp.maximum(x @ w1 + b1, 0.0)
    v = jnp.maximum(h @ wv1 + bv1, 0.0) @ wv2 + bv2
    a = jnp.maximum(h @ wa1 + ba1, 0.0) @ wa2 + ba2
    return v + (a - jnp.mean(a, axis=1, keepdims=True))


def dqn_reference_packed(x, packed_main, packed_head, meta):
    """Pure-JAX emulation of the exact kernel numerics (bf16 ops, f32 acc)."""
    s_pad, n_actions = meta["s_pad"], meta["n_actions"]
    B, S = x.shape
    xq = jnp.pad(x.astype(packed_main.dtype), ((0, 0), (0, s_pad - S)))
    f32 = jnp.float32
    w1 = packed_main[0:s_pad, 0:TRUNK_PAD]
    b1 = packed_main[meta["r_b1"]:meta["r_b1"] + 1, 0:TRUNK_PAD].astype(f32)
    h = jnp.maximum(jnp.dot(xq, w1, preferred_element_type=f32) + b1, 0.0)
    h = h.astype(packed_main.dtype)
    ws = packed_main[meta["r_ws"]:meta["r_ws"] + TRUNK_PAD, :]
    bs = packed_main[meta["r_bs"]:meta["r_bs"] + 1, :].astype(f32)
    hva = jnp.maximum(jnp.dot(h, ws, preferred_element_type=f32) + bs, 0.0)
    hva = hva.astype(packed_main.dtype)
    wh = packed_head[0:meta["r_bh"], :]
    bh = packed_head[meta["r_bh"]:meta["r_bh"] + 1, :].astype(f32)
    out = jnp.dot(hva, wh, preferred_element_type=f32) + bh
    return out[:, :n_actions]


if __name__ == "__main__":
    # LunarLander-v2: state_shape=8, n_actions=4; small batch of 2.
    state_shape, n_actions, batch = 8, 4, 2

    key = jax.random.PRNGKey(0)
    pkey, xkey = jax.random.split(key)
    params = init_dqn_params(pkey, state_shape, n_actions)
    x = jax.random.normal(xkey, (batch, state_shape), jnp.float32)

    packed_main, packed_head, meta = pack_params(params, state_shape, n_actions)

    q = dqn_forward(x, packed_main, packed_head, meta)
    q = jax.block_until_ready(q)
    assert q.shape == (batch, n_actions)

    # tight check against a reference with identical (bf16-quantized, folded) numerics
    q_pk = dqn_reference_packed(x, packed_main, packed_head, meta)
    assert jnp.allclose(q, q_pk, atol=2e-3, rtol=2e-3), (q, q_pk)

    # loose sanity check against the original full-f32 forward pass
    q_f32 = dqn_reference_f32(x, params)
    assert jnp.allclose(q, q_f32, atol=5e-2, rtol=5e-2), (q, q_f32)

    print("KERNEL_OK")
</pallas_src>

<mosaic_0001>
module attributes {stable_mosaic.version = 11 : i64} {
  func.func @_dqn_kernel(%arg0: i32, %arg1: memref<16x16xbf16, #tpu.memory_space<vmem>>, %arg2: memref<304x1024xbf16, #tpu.memory_space<vmem>>, %arg3: memref<1040x128xbf16, #tpu.memory_space<vmem>>, %arg4: memref<16x128xf32, #tpu.memory_space<vmem>>) attributes {dimension_semantics = [#tpu.dimension_semantics<parallel>], iteration_bounds = array<i64: 1>, scalar_prefetch = 0 : i64, scratch_operands = 0 : i64, tpu.core_type = #tpu.core_type<tc>, window_params = [{transform_indices = @transform_0, window_bounds = array<i64: 16, 16>}, {pipeline_mode = #tpu.pipeline_mode<synchronous>, transform_indices = @transform_1, window_bounds = array<i64: 304, 1024>}, {pipeline_mode = #tpu.pipeline_mode<synchronous>, transform_indices = @transform_2, window_bounds = array<i64: 1040, 128>}, {transform_indices = @transform_3, window_bounds = array<i64: 16, 128>}]} {
    %c0 = arith.constant 0 : index
    %c0_0 = arith.constant 0 : index
    %0 = vector.load %arg1[%c0, %c0_0] : memref<16x16xbf16, #tpu.memory_space<vmem>>, vector<16x16xbf16>
    %c0_1 = arith.constant 0 : index
    %c0_2 = arith.constant 0 : index
    %1 = vector.load %arg2[%c0_1, %c0_2] : memref<304x1024xbf16, #tpu.memory_space<vmem>>, vector<16x256xbf16>
    %c16 = arith.constant 16 : index
    %c0_3 = arith.constant 0 : index
    %2 = vector.load %arg2[%c16, %c0_3] : memref<304x1024xbf16, #tpu.memory_space<vmem>>, vector<1x256xbf16>
    %3 = arith.extf %2 : vector<1x256xbf16> to vector<1x256xf32>
    %cst = arith.constant dense<0.000000e+00> : vector<16x256xf32>
    %4 = tpu.matmul %0, %1, %cst {dimension_numbers = #tpu.dot_dimension_numbers<[1], [0], [0], [1], [0, 0, 1, 1], [], []>} : vector<16x16xbf16>, vector<16x256xbf16>, vector<16x256xf32> -> vector<16x256xf32>
    %5 = vector.broadcast %3 : vector<1x256xf32> to vector<16x256xf32>
    %6 = arith.addf %4, %5 : vector<16x256xf32>
    %cst_4 = arith.constant 0.000000e+00 : f32
    %7 = vector.broadcast %cst_4 : f32 to vector<16x256xf32>
    %8 = arith.maximumf %6, %7 : vector<16x256xf32>
    %9 = arith.truncf %8 : vector<16x256xf32> to vector<16x256xbf16>
    %c32 = arith.constant 32 : index
    %c0_5 = arith.constant 0 : index
    %10 = vector.load %arg2[%c32, %c0_5] : memref<304x1024xbf16, #tpu.memory_space<vmem>>, vector<256x1024xbf16>
    %c288 = arith.constant 288 : index
    %c0_6 = arith.constant 0 : index
    %11 = vector.load %arg2[%c288, %c0_6] : memref<304x1024xbf16, #tpu.memory_space<vmem>>, vector<1x1024xbf16>
    %12 = arith.extf %11 : vector<1x1024xbf16> to vector<1x1024xf32>
    %cst_7 = arith.constant dense<0.000000e+00> : vector<16x1024xf32>
    %13 = tpu.matmul %9, %10, %cst_7 {dimension_numbers = #tpu.dot_dimension_numbers<[1], [0], [0], [1], [0, 0, 1, 1], [], []>} : vector<16x256xbf16>, vector<256x1024xbf16>, vector<16x1024xf32> -> vector<16x1024xf32>
    %14 = vector.broadcast %12 : vector<1x1024xf32> to vector<16x1024xf32>
    %15 = arith.addf %13, %14 : vector<16x1024xf32>
    %cst_8 = arith.constant 0.000000e+00 : f32
    %16 = vector.broadcast %cst_8 : f32 to vector<16x1024xf32>
    %17 = arith.maximumf %15, %16 : vector<16x1024xf32>
    %18 = arith.truncf %17 : vector<16x1024xf32> to vector<16x1024xbf16>
    %c0_9 = arith.constant 0 : index
    %c0_10 = arith.constant 0 : index
    %19 = vector.load %arg3[%c0_9, %c0_10] : memref<1040x128xbf16, #tpu.memory_space<vmem>>, vector<1024x128xbf16>
    %c1024 = arith.constant 1024 : index
    %c0_11 = arith.constant 0 : index
    %20 = vector.load %arg3[%c1024, %c0_11] : memref<1040x128xbf16, #tpu.memory_space<vmem>>, vector<1x128xbf16>
    %21 = arith.extf %20 : vector<1x128xbf16> to vector<1x128xf32>
    %cst_12 = arith.constant dense<0.000000e+00> : vector<16x128xf32>
    %22 = tpu.matmul %18, %19, %cst_12 {dimension_numbers = #tpu.dot_dimension_numbers<[1], [0], [0], [1], [0, 0, 1, 1], [], []>} : vector<16x1024xbf16>, vector<1024x128xbf16>, vector<16x128xf32> -> vector<16x128xf32>
    %23 = vector.broadcast %21 : vector<1x128xf32> to vector<16x128xf32>
    %24 = arith.addf %22, %23 : vector<16x128xf32>
    %c0_13 = arith.constant 0 : index
    %c0_14 = arith.constant 0 : index
    %25 = vector.load %arg4[%c0_13, %c0_14] : memref<16x128xf32, #tpu.memory_space<vmem>>, vector<16x128xf32>
    tpu.vector_store %arg4[%c0_13, %c0_14], %24 {strides = array<i32>} : memref<16x128xf32, #tpu.memory_space<vmem>>, vector<16x128xf32>,
    return
  }
  func.func @transform_0(%arg0: i32) -> (i32, i32) {
    %c0_i32 = arith.constant 0 : i32
    %c0_i32_0 = arith.constant 0 : i32
    return %arg0, %c0_i32 : i32, i32
  }
  func.func @transform_1(%arg0: i32) -> (i32, i32) {
    %c0_i32 = arith.constant 0 : i32
    %c0_i32_0 = arith.constant 0 : i32
    %c0_i32_1 = arith.constant 0 : i32
    return %c0_i32, %c0_i32_0 : i32, i32
  }
  func.func @transform_2(%arg0: i32) -> (i32, i32) {
    %c0_i32 = arith.constant 0 : i32
    %c0_i32_0 = arith.constant 0 : i32
    %c0_i32_1 = arith.constant 0 : i32
    return %c0_i32, %c0_i32_0 : i32, i32
  }
  func.func @transform_3(%arg0: i32) -> (i32, i32) {
    %c0_i32 = arith.constant 0 : i32
    %c0_i32_0 = arith.constant 0 : i32
    return %arg0, %c0_i32 : i32, i32
  }
}

</mosaic_0001>

<bundles_post_ra>
// kernel: tpu_custom_call.1
= control target key start
LH: loop header
LB: loop body
LE: loop exit
PB: predicated region body
PF: predicated region fallthrough
CT: control target
= control target key end

     0   :  { %8 = vsyncpa [#allocation3], 0  ;;  %s2358_s0 = inlined_call_operand.hbm [shape: bf16[16,16], index: 0, kind: input, shape index: {}]   ;;  %s2359_s1 = inlined_call_operand.hbm [shape: bf16[304,1024], index: 1, kind: input, shape index: {}]   ;;  %s2360_s2 = inlined_call_operand.hbm [shape: bf16[1040,128], index: 2, kind: input, shape index: {}]   ;;  %s2361_s3 = inlined_call_operand.hbm [shape: f32[16,128], index: 3, kind: output, shape index: {}]  }
   0x1   :  { %9 = vsyncpa [#allocation6], 0 }
   0x2   :  { %10 = vsyncpa [#allocation4], 0  ;;  %s2296_s12 = smov [#allocation5]  }
   0x3   :  { %s28_s13 = sshll.u32 %s2296_s12, 4  ;;  %s29_s13 = int_to_ptr.vmem [resolvable:$true] %s28_s13 }
   0x4   :  { %s2218_s14 = scalar_lea.vmem %s29_s13, 19456  ;;  %p2223_p1 = scmp.lt.s32.totalorder %s29_s13, %s29_s13 }
   0x5   :  { %p2219_p0 = scmp.ne.s32.totalorder %s29_s13, %s2218_s14  ;;  %p2224_p2 = scmp.lt.s32.totalorder %s2218_s14, %s2218_s14 }
   0x7   :  { %p2225_p3 = por %p2224_p2, %p2223_p1 }
   0x9   :  { %p2226_p4 = pnand %p2225_p3, %p2219_p0 }
   0xb   :  { %2229 = shalt.err (!%p2226_p4)
}
   0xc   :  { %s2297_s15 = smov 512   ;;  %s2298_s16 = smov 32  }
   0xd   :  { %34 = dma.hbm_to_vmem [thread:$0]  %s2359_s1, 19456, %s29_s13, [#allocation6], %s2297_s15, %s2297_s15, %s2298_s16  }
   0xe   :  { %s2299_s19 = smov [#allocation2]  }
   0xf   :  { %s16_s20 = sshll.u32 %s2299_s19, 4  ;;  %s17_s20 = int_to_ptr.vmem [resolvable:$true] %s16_s20 }
  0x10   :  { %s2238_s21 = scalar_lea.vmem %s17_s20, 128  ;;  %p2243_p6 = scmp.lt.s32.totalorder %s17_s20, %s17_s20 }
  0x11   :  { %p2239_p5 = scmp.ne.s32.totalorder %s17_s20, %s2238_s21  ;;  %p2244_p7 = scmp.lt.s32.totalorder %s2238_s21, %s2238_s21 }
  0x13   :  { %p2245_p8 = por %p2244_p7, %p2243_p6 }
  0x15   :  { %p2246_p9 = pnand %p2245_p8, %p2239_p5 }
  0x17   :  { %2249 = shalt.err (!%p2246_p9)
}
  0x18   :  { %s2300_s22 = smov 64   ;;  %s2301_s23 = smov 4  }
  0x19   :  { %22 = dma.hbm_to_vmem [thread:$0]  %s2358_s0, 128, %s17_s20, [#allocation3], %s2300_s22, %s2300_s22, %s2301_s23  }
  0x1a   :  { %s2302_s26 = smov [#allocation7]  }
  0x1b   :  { %s40_s27 = sshll.u32 %s2302_s26, 4  ;;  %s41_s27 = int_to_ptr.vmem [resolvable:$true] %s40_s27 }
  0x1c   :  { %s2258_s1 = scalar_lea.vmem %s41_s27, 8320  ;;  %p2263_p11 = scmp.lt.s32.totalorder %s41_s27, %s41_s27 }
  0x1d   :  { %p2259_p10 = scmp.ne.s32.totalorder %s41_s27, %s2258_s1  ;;  %p2264_p12 = scmp.lt.s32.totalorder %s2258_s1, %s2258_s1 }
  0x1f   :  { %p2265_p13 = por %p2264_p12, %p2263_p11 }
  0x21   :  { %p2266_p0 = pnand %p2265_p13, %p2259_p10 }
  0x23   :  { %2269 = shalt.err (!%p2266_p0)
}
  0x24   :  { %46 = dma.hbm_to_vmem [thread:$0]  %s2360_s2, 8320, %s41_s27, [#allocation6], %s2300_s22, %s2300_s22, %s2301_s23  }
  0x25   :  { %2290 = dma.done.wait [#allocation3], 128  }
  0x26   :  { %2291 = vsyncadd [#allocation3], 4294967168 }
  0x27   :  { %2292 = dma.done.wait [#allocation6], 27776  }
  0x28   :  { %2293 = vsyncadd [#allocation6], 4294939520  ;;  %v2303_v0 = vmov 0   ;;  %v59_v1 = vld [vmem:[#allocation5] sm:$0xff]  ;;  %v2145_v5 = vld [vmem:[#allocation2] sm:$0xff]   ;;  %vm87_vm0 = vcmask 130048  }
  0x29   :  { %123 = vmatprep.mubr.bf16.mxu0 %v2303_v0  ;;  %v60_v2 = vld [vmem:[#allocation5 + $0x20] sm:$0xff]  ;;  %v197_v8 = vld [vmem:[#allocation5 + $0x248] sm:$0xff]  ;;  %s2304_s0 = smov [#allocation8]  }
  0x2a   :  { %v1852_v3 = vcombine.high %v59_v1, %v60_v2  ;;  %v1851_v4 = vcombine.low %v59_v1, %v60_v2  ;;  %v196_v6 = vld [vmem:[#allocation5 + $0x240] sm:$0xff]  ;;  %v201_v9 = vld [vmem:[#allocation5 + $0x268] sm:$0xff]  ;;  %s1837_s2 = sshll.u32 %s2304_s0, 4  ;;  %s1838_s2 = int_to_ptr.vmem [resolvable:$true] %s1837_s2 }
  0x2b   :  { %v200_v7 = vld [vmem:[#allocation5 + $0x260] sm:$0xff]  ;;  %v1913_v11 = vcombine.high %v197_v8, %v201_v9  ;;  %v189_v15 = vld [vmem:[#allocation5 + $0x208] sm:$0xff]  ;;  %v1912_v16 = vcombine.low %v197_v8, %v201_v9  ;;  %s2270_s30 = scalar_lea.vmem %s1838_s2, 256  ;;  %p2275_p2 = scmp.lt.s32.totalorder %s1838_s2, %s1838_s2 }
  0x2c   :  { %105 = vmatprep.subr.bf16.mxu0 %v1852_v3  ;;  %v1911_v10 = vcombine.high %v196_v6, %v200_v7  ;;  %v1910_v12 = vcombine.low %v196_v6, %v200_v7  ;;  %v188_v13 = vld [vmem:[#allocation5 + $0x200] sm:$0xff]  ;;  %v193_v18 = vld [vmem:[#allocation5 + $0x228] sm:$0xff]  ;;  %p2271_p1 = scmp.ne.s32.totalorder %s1838_s2, %s2270_s30  ;;  %p2276_p3 = scmp.lt.s32.totalorder %s2270_s30, %s2270_s30 }
  0x2d   :  { %v192_v14 = vld [vmem:[#allocation5 + $0x220] sm:$0xff]  ;;  %106 = vmatpush1.bf16.msra.mxu0 %v1851_v4  ;;  %v1905_v21 = vcombine.high %v189_v15, %v193_v18  ;;  %v181_v23 = vld [vmem:[#allocation5 + $0x1c8] sm:$0xff]  ;;  %v1904_v26 = vcombine.low %v189_v15, %v193_v18 }
  0x2e   :  { %v1903_v17 = vcombine.high %v188_v13, %v192_v14  ;;  %v180_v19 = vld [vmem:[#allocation5 + $0x1c0] sm:$0xff]  ;;  %952 = vmatprep.subr.bf16.mxu1 %v1911_v10  ;;  %995 = vmatprep.subr.bf16.mxu0 %v1913_v11  ;;  %v1902_v22 = vcombine.low %v188_v13, %v192_v14  ;;  %v185_v24 = vld [vmem:[#allocation5 + $0x1e8] sm:$0xff]  ;;  %p2277_p4 = por %p2276_p3, %p2275_p2 }
  0x2f   :  { %v184_v20 = vld [vmem:[#allocation5 + $0x1e0] sm:$0xff]  ;;  %953 = vmatpush1.bf16.msra.mxu1 %v1910_v12  ;;  %v1897_v29 = vcombine.high %v181_v23, %v185_v24  ;;  %v173_v31 = vld [vmem:[#allocation5 + $0x188] sm:$0xff]  ;;  %v1896_v34 = vcombine.low %v181_v23, %v185_v24 }
  0x30   :  { %1853 = vmatmul.mubr.msk.bf16.vlgmr.msra.gmra.mxu0 %vm87_vm0, %v2145_v5  ;;  %954 = vmatprep.subr.bf16.mxu1 %v1903_v17  ;;  %v1895_v25 = vcombine.high %v180_v19, %v184_v20  ;;  %v172_v27 = vld [vmem:[#allocation5 + $0x180] sm:$0xff]  ;;  %v1894_v30 = vcombine.low %v180_v19, %v184_v20  ;;  %v177_v32 = vld [vmem:[#allocation5 + $0x1a8] sm:$0xff]  ;;  %p2278_p5 = pnand %p2277_p4, %p2271_p1 }
  0x31   :  { %996 = vmatpush1.bf16.msra.mxu0 %v1912_v16  ;;  %v176_v28 = vld [vmem:[#allocation5 + $0x1a0] sm:$0xff]  ;;  %v1889_v37 = vcombine.high %v173_v31, %v177_v32  ;;  %v165_v39 = vld [vmem:[#allocation5 + $0x148] sm:$0xff]  ;;  %v1888_v42 = vcombine.low %v173_v31, %v177_v32 }
  0x32   :  { %997 = vmatprep.subr.bf16.mxu0 %v1905_v21  ;;  %v1887_v33 = vcombine.high %v172_v27, %v176_v28  ;;  %v164_v35 = vld [vmem:[#allocation5 + $0x140] sm:$0xff]  ;;  %v1886_v38 = vcombine.low %v172_v27, %v176_v28  ;;  %v169_v40 = vld [vmem:[#allocation5 + $0x168] sm:$0xff] }
  0x33   :  { %955 = vmatpush1.bf16.msra.mxu1 %v1902_v22  ;;  %v168_v36 = vld [vmem:[#allocation5 + $0x160] sm:$0xff]  ;;  %v1881_v45 = vcombine.high %v165_v39, %v169_v40  ;;  %v157_v47 = vld [vmem:[#allocation5 + $0x108] sm:$0xff]  ;;  %v1880_v52 = vcombine.low %v165_v39, %v169_v40 }
  0x34   :  { %956 = vmatprep.subr.bf16.mxu1 %v1895_v25  ;;  %v1879_v41 = vcombine.high %v164_v35, %v168_v36  ;;  %v156_v43 = vld [vmem:[#allocation5 + $0x100] sm:$0xff]  ;;  %v1878_v46 = vcombine.low %v164_v35, %v168_v36  ;;  %v161_v48 = vld [vmem:[#allocation5 + $0x128] sm:$0xff] }
  0x35   :  { %998 = vmatpush1.bf16.msra.mxu0 %v1904_v26  ;;  %v160_v44 = vld [vmem:[#allocation5 + $0x120] sm:$0xff]  ;;  %v149_v53 = vld [vmem:[#allocation5 + $0xc8] sm:$0xff]  ;;  %v1873_v55 = vcombine.high %v157_v47, %v161_v48  ;;  %v1872_v60 = vcombine.low %v157_v47, %v161_v48 }
  0x36   :  { %999 = vmatprep.subr.bf16.mxu0 %v1897_v29  ;;  %v148_v49 = vld [vmem:[#allocation5 + $0xc0] sm:$0xff]  ;;  %v1871_v50 = vcombine.high %v156_v43, %v160_v44  ;;  %v153_v54 = vld [vmem:[#allocation5 + $0xe8] sm:$0xff]  ;;  %v1870_v56 = vcombine.low %v156_v43, %v160_v44 }
  0x37   :  { %957 = vmatpush1.bf16.msra.mxu1 %v1894_v30  ;;  %v152_v51 = vld [vmem:[#allocation5 + $0xe0] sm:$0xff]  ;;  %v141_v61 = vld [vmem:[#allocation5 + $0x88] sm:$0xff]  ;;  %v1865_v63 = vcombine.high %v149_v53, %v153_v54  ;;  %v1864_v4 = vcombine.low %v149_v53, %v153_v54 }
  0x38   :  { %958 = vmatprep.subr.bf16.mxu1 %v1887_v33  ;;  %v140_v57 = vld [vmem:[#allocation5 + $0x80] sm:$0xff]  ;;  %v1863_v59 = vcombine.high %v148_v49, %v152_v51  ;;  %v145_v62 = vld [vmem:[#allocation5 + $0xa8] sm:$0xff]  ;;  %v1862_v0 = vcombine.low %v148_v49, %v152_v51 }
  0x39   :  { %1000 = vmatpush1.bf16.msra.mxu0 %v1896_v34  ;;  %v144_v58 = vld [vmem:[#allocation5 + $0xa0] sm:$0xff]  ;;  %v261_v5 = vld [vmem:[#allocation5 + $0x448] sm:$0xff]  ;;  %v1857_v7 = vcombine.high %v141_v61, %v145_v62  ;;  %v1856_v12 = vcombine.low %v141_v61, %v145_v62 }
  0x3a   :  { %1001 = vmatprep.subr.bf16.mxu0 %v1889_v37  ;;  %v260_v1 = vld [vmem:[#allocation5 + $0x440] sm:$0xff]  ;;  %v1855_v3 = vcombine.high %v140_v57, %v144_v58  ;;  %v265_v6 = vld [vmem:[#allocation5 + $0x468] sm:$0xff]  ;;  %v1854_v8 = vcombine.low %v140_v57, %v144_v58 }
  0x3b   :  { %959 = vmatpush1.bf16.msra.mxu1 %v1886_v38  ;;  %v264_v2 = vld [vmem:[#allocation5 + $0x460] sm:$0xff]  ;;  %v253_v13 = vld [vmem:[#allocation5 + $0x408] sm:$0xff]  ;;  %v1977_v15 = vcombine.high %v261_v5, %v265_v6  ;;  %v1976_v20 = vcombine.low %v261_v5, %v265_v6  ;;  %v198_v6 = vld [vmem:[#allocation5 + $0x250] sm:$0xff] }
  0x3c   :  { %960 = vmatprep.subr.bf16.mxu1 %v1879_v41  ;;  %v252_v9 = vld [vmem:[#allocation5 + $0x400] sm:$0xff]  ;;  %v1975_v11 = vcombine.high %v260_v1, %v264_v2  ;;  %v257_v14 = vld [vmem:[#allocation5 + $0x428] sm:$0xff]  ;;  %v1974_v16 = vcombine.low %v260_v1, %v264_v2 }
  0x3d   :  { %1002 = vmatpush1.bf16.msra.mxu0 %v1888_v42  ;;  %v256_v10 = vld [vmem:[#allocation5 + $0x420] sm:$0xff]  ;;  %v245_v21 = vld [vmem:[#allocation5 + $0x3c8] sm:$0xff]  ;;  %v1969_v23 = vcombine.high %v253_v13, %v257_v14  ;;  %v1968_v28 = vcombine.low %v253_v13, %v257_v14  ;;  %v64_v14 = vlaneseq }
  0x3e   :  { %1003 = vmatprep.subr.bf16.mxu0 %v1881_v45  ;;  %v244_v17 = vld [vmem:[#allocation5 + $0x3c0] sm:$0xff]  ;;  %v1967_v19 = vcombine.high %v252_v9, %v256_v10  ;;  %v249_v22 = vld [vmem:[#allocation5 + $0x3e8] sm:$0xff]  ;;  %v1966_v24 = vcombine.low %v252_v9, %v256_v10  ;;  %v203_v10 = vld [vmem:[#allocation5 + $0x278] sm:$0xff] }
  0x3f   :  { %961 = vmatpush1.bf16.msra.mxu1 %v1878_v46  ;;  %v248_v18 = vld [vmem:[#allocation5 + $0x3e0] sm:$0xff]  ;;  %v237_v29 = vld [vmem:[#allocation5 + $0x388] sm:$0xff]  ;;  %v1961_v31 = vcombine.high %v245_v21, %v249_v22  ;;  %v1960_v36 = vcombine.low %v245_v21, %v249_v22 }
  0x40   :  { %962 = vmatprep.subr.bf16.mxu1 %v1871_v50  ;;  %v236_v25 = vld [vmem:[#allocation5 + $0x380] sm:$0xff]  ;;  %v1959_v27 = vcombine.high %v244_v17, %v248_v18  ;;  %v241_v30 = vld [vmem:[#allocation5 + $0x3a8] sm:$0xff]  ;;  %v1958_v32 = vcombine.low %v244_v17, %v248_v18 }
  0x41   :  { %1004 = vmatpush1.bf16.msra.mxu0 %v1880_v52  ;;  %v240_v26 = vld [vmem:[#allocation5 + $0x3a0] sm:$0xff]  ;;  %v229_v37 = vld [vmem:[#allocation5 + $0x348] sm:$0xff]  ;;  %v1953_v39 = vcombine.high %v237_v29, %v241_v30  ;;  %v1952_v42 = vcombine.low %v237_v29, %v241_v30 }
  0x42   :  { %1005 = vmatprep.subr.bf16.mxu0 %v1873_v55  ;;  %v228_v33 = vld [vmem:[#allocation5 + $0x340] sm:$0xff]  ;;  %v1951_v35 = vcombine.high %v236_v25, %v240_v26  ;;  %v233_v38 = vld [vmem:[#allocation5 + $0x368] sm:$0xff]  ;;  %v1950_v40 = vcombine.low %v236_v25, %v240_v26 }
  0x43   :  { %963 = vmatpush1.bf16.msra.mxu1 %v1870_v56  ;;  %v232_v34 = vld [vmem:[#allocation5 + $0x360] sm:$0xff]  ;;  %v1945_v43 = vcombine.high %v229_v37, %v233_v38  ;;  %v1944_v45 = vcombine.low %v229_v37, %v233_v38  ;;  %v221_v48 = vld [vmem:[#allocation5 + $0x308] sm:$0xff]  ;;  %v195_v37 = vld [vmem:[#allocation5 + $0x238] sm:$0xff] }
  0x44   :  { %964 = vmatprep.subr.bf16.mxu1 %v1863_v59  ;;  %v1943_v41 = vcombine.high %v228_v33, %v232_v34  ;;  %v1942_v44 = vcombine.low %v228_v33, %v232_v34  ;;  %v220_v46 = vld [vmem:[#allocation5 + $0x300] sm:$0xff]  ;;  %v225_v50 = vld [vmem:[#allocation5 + $0x328] sm:$0xff]  ;;  %v190_v33 = vld [vmem:[#allocation5 + $0x210] sm:$0xff] }
  0x45   :  { %1006 = vmatpush1.bf16.msra.mxu0 %v1872_v60  ;;  %v224_v47 = vld [vmem:[#allocation5 + $0x320] sm:$0xff]  ;;  %v1936_v51 = vcombine.low %v221_v48, %v225_v50  ;;  %v1937_v52 = vcombine.high %v221_v48, %v225_v50  ;;  %v213_v56 = vld [vmem:[#allocation5 + $0x2c8] sm:$0xff]  ;;  %v174_v50 = vld [vmem:[#allocation5 + $0x190] sm:$0xff] }
  0x46   :  { %1007 = vmatprep.subr.bf16.mxu0 %v1865_v63  ;;  %v1935_v49 = vcombine.high %v220_v46, %v224_v47  ;;  %v1934_v53 = vcombine.low %v220_v46, %v224_v47  ;;  %v212_v54 = vld [vmem:[#allocation5 + $0x2c0] sm:$0xff]  ;;  %v217_v58 = vld [vmem:[#allocation5 + $0x2e8] sm:$0xff] }
  0x47   :  { %965 = vmatpush1.bf16.msra.mxu1 %v1862_v0  ;;  %v216_v55 = vld [vmem:[#allocation5 + $0x2e0] sm:$0xff]  ;;  %v1928_v59 = vcombine.low %v213_v56, %v217_v58  ;;  %v1929_v60 = vcombine.high %v213_v56, %v217_v58  ;;  %v205_v0 = vld [vmem:[#allocation5 + $0x288] sm:$0xff]  ;;  %v166_v58 = vld [vmem:[#allocation5 + $0x150] sm:$0xff] }
  0x48   :  { %966 = vmatprep.subr.bf16.mxu1 %v1855_v3  ;;  %v1927_v57 = vcombine.high %v212_v54, %v216_v55  ;;  %v1926_v61 = vcombine.low %v212_v54, %v216_v55  ;;  %v204_v62 = vld [vmem:[#allocation5 + $0x280] sm:$0xff]  ;;  %v209_v2 = vld [vmem:[#allocation5 + $0x2a8] sm:$0xff] }
  0x49   :  { %1008 = vmatpush1.bf16.msra.mxu0 %v1864_v4  ;;  %v208_v63 = vld [vmem:[#allocation5 + $0x2a0] sm:$0xff]  ;;  %v1920_v3 = vcombine.low %v205_v0, %v209_v2  ;;  %v1921_v4 = vcombine.high %v205_v0, %v209_v2  ;;  %v158_v2 = vld [vmem:[#allocation5 + $0x110] sm:$0xff] }
  0x4a   :  { %1009 = vmatprep.subr.bf16.mxu0 %v1857_v7  ;;  %v1919_v1 = vcombine.high %v204_v62, %v208_v63  ;;  %v1918_v5 = vcombine.low %v204_v62, %v208_v63  ;;  %v202_v7 = vld [vmem:[#allocation5 + $0x270] sm:$0xff] }
  0x4b   :  { %967 = vmatpush1.bf16.msra.mxu1 %v1854_v8  ;;  %v199_v8 = vld [vmem:[#allocation5 + $0x258] sm:$0xff]  ;;  %v1915_v9 = vcombine.high %v198_v6, %v202_v7 }
  0x4c   :  { %968 = vmatprep.subr.bf16.mxu1 %v1975_v11  ;;  %v1914_v11 = vcombine.low %v198_v6, %v202_v7  ;;  %v1917_v13 = vcombine.high %v199_v8, %v203_v10 }
  0x4d   :  { %1010 = vmatpush1.bf16.msra.mxu0 %v1856_v12  ;;  %v1916_v12 = vcombine.low %v199_v8, %v203_v10  ;;  %v150_v10 = vld [vmem:[#allocation5 + $0xd0] sm:$0xff] }
  0x4e   :  { %1011 = vmatprep.subr.bf16.mxu0 %v1977_v15  ;;  %v65_v15 = vshrl.u32 %v64_v14, 7 }
  0x4f   :  { %969 = vmatpush2.bf16.msra.mxu1 %v1974_v16  ;;  %v61_v16 = vld [vmem:[#allocation5 + $0x40] sm:$0x11] }
  0x50   :  { %970 = vmatprep.subr.bf16.mxu1 %v1967_v19  ;;  %v63_v17 = vunpack.c.h.bf16 %v61_v16  ;;  %v62_v18 = vunpack.c.l.bf16 %v61_v16  ;;  %v2336_v19 = vsub.s32 0, %v65_v15 }
  0x51   :  { %1012 = vmatpush2.bf16.msra.mxu0 %v1976_v20 }
  0x52   :  { %1013 = vmatprep.subr.bf16.mxu0 %v1969_v23  ;;  %v71_v21 = vrot.slane %v63_v17, %v2336_v19  ;;  %v67_v22 = vrot.slane %v62_v18, %v2336_v19  ;;  %v142_v18 = vld [vmem:[#allocation5 + $0x90] sm:$0xff] }
  0x53   :  { %971 = vmatpush2.bf16.msra.mxu1 %v1966_v24 }
  0x54   :  { %972 = vmatprep.subr.bf16.mxu1 %v1959_v27 }
  0x55   :  { %1014 = vmatpush2.bf16.msra.mxu0 %v1968_v28 }
  0x56   :  { %1015 = vmatprep.subr.bf16.mxu0 %v1961_v31 }
  0x57   :  { %973 = vmatpush2.bf16.msra.mxu1 %v1958_v32 }
  0x58   :  { %974 = vmatprep.subr.bf16.mxu1 %v1951_v35  ;;  %v194_v35 = vld [vmem:[#allocation5 + $0x230] sm:$0xff] }
  0x59   :  { %1016 = vmatpush2.bf16.msra.mxu0 %v1960_v36  ;;  %v191_v36 = vld [vmem:[#allocation5 + $0x218] sm:$0xff]  ;;  %v1906_v46 = vcombine.low %v190_v33, %v194_v35 }
  0x5a   :  { %1017 = vmatprep.subr.bf16.mxu0 %v1953_v39  ;;  %v1908_v47 = vcombine.low %v191_v36, %v195_v37 }
  0x5b   :  { %975 = vmatpush2.bf16.msra.mxu1 %v1950_v40  ;;  %v182_v40 = vld [vmem:[#allocation5 + $0x1d0] sm:$0xff] }
  0x5c   :  { %976 = vmatprep.subr.bf16.mxu1 %v1943_v41  ;;  %v1907_v41 = vcombine.high %v190_v33, %v194_v35  ;;  %v254_v35 = vld [vmem:[#allocation5 + $0x410] sm:$0xff] }
  0x5d   :  { %1018 = vmatpush2.bf16.msra.mxu0 %v1952_v42  ;;  %v1909_v42 = vcombine.high %v191_v36, %v195_v37  ;;  %v258_v36 = vld [vmem:[#allocation5 + $0x430] sm:$0xff]  ;;  %v255_v37 = vld [vmem:[#allocation5 + $0x418] sm:$0xff] }
  0x5e   :  { %1019 = vmatprep.subr.bf16.mxu0 %v1945_v43  ;;  %v186_v43 = vld [vmem:[#allocation5 + $0x1f0] sm:$0xff] }
  0x5f   :  { %977 = vmatpush2.bf16.msra.mxu1 %v1942_v44  ;;  %v183_v44 = vld [vmem:[#allocation5 + $0x1d8] sm:$0xff]  ;;  %v1899_v48 = vcombine.high %v182_v40, %v186_v43  ;;  %v1898_v54 = vcombine.low %v182_v40, %v186_v43 }
  0x60   :  { %978 = vmatprep.subr.bf16.mxu1 %v1935_v49 }
  0x61   :  { %1020 = vmatpush2.bf16.msra.mxu0 %v1944_v45  ;;  %v187_v45 = vld [vmem:[#allocation5 + $0x1f8] sm:$0xff] }
  0x62   :  { %1021 = vmatprep.subr.bf16.mxu0 %v1937_v52  ;;  %v1901_v49 = vcombine.high %v183_v44, %v187_v45  ;;  %v175_v52 = vld [vmem:[#allocation5 + $0x198] sm:$0xff]  ;;  %v1900_v55 = vcombine.low %v183_v44, %v187_v45  ;;  %v246_v44 = vld [vmem:[#allocation5 + $0x3d0] sm:$0xff] }
  0x63   :  { %979 = vmatpush2.bf16.msra.mxu1 %v1934_v53  ;;  %v179_v53 = vld [vmem:[#allocation5 + $0x1b8] sm:$0xff]  ;;  %v250_v45 = vld [vmem:[#allocation5 + $0x3f0] sm:$0xff] }
  0x64   :  { %980 = vmatprep.subr.bf16.mxu1 %v1927_v57  ;;  %v1893_v57 = vcombine.high %v175_v52, %v179_v53  ;;  %v1892_v63 = vcombine.low %v175_v52, %v179_v53  ;;  %v238_v52 = vld [vmem:[#allocation5 + $0x390] sm:$0xff] }
  0x65   :  { %1022 = vmatpush2.bf16.msra.mxu0 %v1936_v51  ;;  %v178_v51 = vld [vmem:[#allocation5 + $0x1b0] sm:$0xff] }
  0x66   :  { %1023 = vmatprep.subr.bf16.mxu0 %v1929_v60  ;;  %v1891_v56 = vcombine.high %v174_v50, %v178_v51  ;;  %v167_v60 = vld [vmem:[#allocation5 + $0x158] sm:$0xff]  ;;  %v1890_v62 = vcombine.low %v174_v50, %v178_v51  ;;  %v1963_v50 = vcombine.high %v246_v44, %v250_v45  ;;  %v242_v53 = vld [vmem:[#allocation5 + $0x3b0] sm:$0xff] }
  0x67   :  { %981 = vmatpush2.bf16.msra.mxu1 %v1926_v61  ;;  %v171_v61 = vld [vmem:[#allocation5 + $0x178] sm:$0xff] }
  0x68   :  { %982 = vmatprep.subr.bf16.mxu1 %v1919_v1  ;;  %v1885_v1 = vcombine.high %v167_v60, %v171_v61  ;;  %v1884_v7 = vcombine.low %v167_v60, %v171_v61  ;;  %v230_v60 = vld [vmem:[#allocation5 + $0x350] sm:$0xff] }
  0x69   :  { %1024 = vmatpush2.bf16.msra.mxu0 %v1928_v59  ;;  %v170_v59 = vld [vmem:[#allocation5 + $0x170] sm:$0xff] }
  0x6a   :  { %1025 = vmatprep.subr.bf16.mxu0 %v1921_v4  ;;  %v1883_v0 = vcombine.high %v166_v58, %v170_v59  ;;  %v159_v4 = vld [vmem:[#allocation5 + $0x118] sm:$0xff]  ;;  %v1882_v6 = vcombine.low %v166_v58, %v170_v59  ;;  %v1955_v58 = vcombine.high %v238_v52, %v242_v53  ;;  %v234_v61 = vld [vmem:[#allocation5 + $0x370] sm:$0xff] }
  0x6b   :  { %983 = vmatpush2.bf16.msra.mxu1 %v1918_v5  ;;  %v163_v5 = vld [vmem:[#allocation5 + $0x138] sm:$0xff] }
  0x6c   :  { %1038 = vmatprep.subr.bf16.mxu1 %v1915_v9  ;;  %v1877_v9 = vcombine.high %v159_v4, %v163_v5  ;;  %v1876_v15 = vcombine.low %v159_v4, %v163_v5  ;;  %v222_v4 = vld [vmem:[#allocation5 + $0x310] sm:$0xff] }
  0x6d   :  { %1026 = vmatpush2.bf16.msra.mxu0 %v1920_v3  ;;  %v162_v3 = vld [vmem:[#allocation5 + $0x130] sm:$0xff] }
  0x6e   :  { %1081 = vmatprep.subr.bf16.mxu0 %v1917_v13  ;;  %v1875_v8 = vcombine.high %v158_v2, %v162_v3  ;;  %v155_v13 = vld [vmem:[#allocation5 + $0xf8] sm:$0xff]  ;;  %v1874_v14 = vcombine.low %v158_v2, %v162_v3  ;;  %v1947_v2 = vcombine.high %v230_v60, %v234_v61  ;;  %v226_v5 = vld [vmem:[#allocation5 + $0x330] sm:$0xff] }
  0xf0   :  { %v125_v20 = vpop.f32.mrf.mxu0 }
  0xf1   :  { %v126_v27 = vadd.f32 %v125_v20, %v67_v22  ;;  %v146_v20 = vld [vmem:[#allocation5 + $0xb0] sm:$0xff] }
  0xf2   :  { %v127_v23 = vpop.f32.mrf.mxu0 }
  0xf3   :  { %v128_v25 = vadd.f32 %v127_v23, %v71_v21  ;;  %v134_v34 = vmax.f32 %v126_v27, 0.0  ;;  %v262_v27 = vld [vmem:[#allocation5 + $0x450] sm:$0xff] }
  0xf4   :  { %v129_v24 = vpop.f32.mrf.mxu0 }
  0xf5   :  { %v130_v26 = vadd.f32 %v129_v24, %v67_v22  ;;  %v135_v31 = vmax.f32 %v128_v25, 0.0  ;;  %v147_v22 = vld [vmem:[#allocation5 + $0xb8] sm:$0xff]  ;;  %v1859_v25 = vcombine.high %v142_v18, %v146_v20 }
  0xf6   :  { %v131_v28 = vpop.f32.mrf.mxu0 }
  0xf7   :  { %v132_v29 = vadd.f32 %v131_v28, %v71_v21  ;;  %v136_v30 = vmax.f32 %v130_v26, 0.0  ;;  %v143_v21 = vld [vmem:[#allocation5 + $0x98] sm:$0xff]  ;;  %v266_v28 = vld [vmem:[#allocation5 + $0x470] sm:$0xff] }
  0xf8   :  { %v1861_v26 = vcombine.high %v143_v21, %v147_v22  ;;  %v1979_v33 = vcombine.high %v262_v27, %v266_v28  ;;  %v1978_v40 = vcombine.low %v262_v27, %v266_v28 }
  0xf9   :  { %v137_v32 = vmax.f32 %v132_v29, 0.0  ;;  %v2340_v39 = vpack.c.bf16 %v136_v30, %v134_v34  ;;  %v263_v29 = vld [vmem:[#allocation5 + $0x458] sm:$0xff] }
  0xfa   :  { %v267_v30 = vld [vmem:[#allocation5 + $0x478] sm:$0xff] }
  0xfb   :  { %v139_v38 = vpack.c.bf16 %v137_v32, %v135_v31  ;;  %v1858_v31 = vcombine.low %v142_v18, %v146_v20  ;;  %v1860_v32 = vcombine.low %v143_v21, %v147_v22  ;;  %v1981_v34 = vcombine.high %v263_v29, %v267_v30  ;;  %v206_v21 = vld [vmem:[#allocation5 + $0x290] sm:$0xff] }
  0xfc   :  { %v210_v22 = vld [vmem:[#allocation5 + $0x2b0] sm:$0xff] }
  0xfd   :  { %984 = vmatprep.mubr.bf16.mxu1 %v139_v38  ;;  %1027 = vmatprep.mubr.bf16.mxu0 %v139_v38  ;;  %v1923_v27 = vcombine.high %v206_v21, %v210_v22 }
  0xfe   :  { %985 = vmatmul.mubr.bf16.vlgmr.msra.gmra.mxu1 %v2340_v39  ;;  %1028 = vmatmul.mubr.bf16.vlgmr.msra.gmra.mxu0 %v2340_v39 }
  0xff   :  { %1039 = vmatpush1.bf16.msra.mxu1 %v1914_v11  ;;  %1082 = vmatpush1.bf16.msra.mxu0 %v1916_v12  ;;  %v154_v11 = vld [vmem:[#allocation5 + $0xf0] sm:$0xff]  ;;  %v151_v12 = vld [vmem:[#allocation5 + $0xd8] sm:$0xff] }
 0x100   :  { %1070 = vmatprep.mubr.bf16.mxu1 %v139_v38  ;;  %1113 = vmatprep.mubr.bf16.mxu0 %v139_v38  ;;  %v1867_v16 = vcombine.high %v150_v10, %v154_v11  ;;  %v1869_v17 = vcombine.high %v151_v12, %v155_v13  ;;  %v1866_v23 = vcombine.low %v150_v10, %v154_v11  ;;  %v259_v38 = vld [vmem:[#allocation5 + $0x438] sm:$0xff] }
 0x101   :  { %1040 = vmatprep.subr.bf16.mxu1 %v1907_v41  ;;  %1083 = vmatprep.subr.bf16.mxu0 %v1909_v42  ;;  %v1868_v24 = vcombine.low %v151_v12, %v155_v13  ;;  %v1980_v41 = vcombine.low %v263_v29, %v267_v30  ;;  %v1971_v42 = vcombine.high %v254_v35, %v258_v36  ;;  %v214_v12 = vld [vmem:[#allocation5 + $0x2d0] sm:$0xff] }
 0x102   :  { %v1973_v43 = vcombine.high %v255_v37, %v259_v38  ;;  %v1939_v10 = vcombine.high %v222_v4, %v226_v5  ;;  %v218_v13 = vld [vmem:[#allocation5 + $0x2f0] sm:$0xff]  ;;  %v1922_v29 = vcombine.low %v206_v21, %v210_v22 }
 0x103   :  { %1041 = vmatpush1.bf16.msra.mxu1 %v1906_v46  ;;  %1084 = vmatpush1.bf16.msra.mxu0 %v1908_v47  ;;  %v247_v46 = vld [vmem:[#allocation5 + $0x3d8] sm:$0xff]  ;;  %v1931_v18 = vcombine.high %v214_v12, %v218_v13 }
 0x104   :  { %1042 = vmatprep.subr.bf16.mxu1 %v1899_v48  ;;  %1085 = vmatprep.subr.bf16.mxu0 %v1901_v49  ;;  %v251_v47 = vld [vmem:[#allocation5 + $0x3f8] sm:$0xff]  ;;  %v1970_v48 = vcombine.low %v254_v35, %v258_v36  ;;  %v1972_v49 = vcombine.low %v255_v37, %v259_v38  ;;  %v2150_v35 = vld [vmem:[#allocation7 + $0x70] sm:$0xff]  }
 0x105   :  { %v1965_v51 = vcombine.high %v247_v46, %v251_v47  ;;  %v2151_v36 = vld [vmem:[#allocation7 + $0xf0] sm:$0xff]  }
 0x106   :  { %v2152_v37 = vld [vmem:[#allocation7 + $0x30] sm:$0xff]  }
 0x107   :  { %1043 = vmatpush1.bf16.msra.mxu1 %v1898_v54  ;;  %1086 = vmatpush1.bf16.msra.mxu0 %v1900_v55  ;;  %v239_v54 = vld [vmem:[#allocation5 + $0x398] sm:$0xff]  ;;  %v2153_v38 = vld [vmem:[#allocation7 + $0xb0] sm:$0xff]  }
 0x108   :  { %1044 = vmatprep.subr.bf16.mxu1 %v1891_v56  ;;  %1087 = vmatprep.subr.bf16.mxu0 %v1893_v57  ;;  %v243_v55 = vld [vmem:[#allocation5 + $0x3b8] sm:$0xff]  ;;  %v1962_v56 = vcombine.low %v246_v44, %v250_v45  ;;  %v1964_v57 = vcombine.low %v247_v46, %v251_v47  ;;  %v2158_v44 = vld [vmem:[#allocation7 + $0x60] sm:$0xff]  }
 0x109   :  { %v1957_v59 = vcombine.high %v239_v54, %v243_v55  ;;  %v2159_v45 = vld [vmem:[#allocation7 + $0xe0] sm:$0xff]   ;;  %v2162_v47 = vld [vmem:[#allocation7 + $0x58] sm:$0xff]  }
 0x10a   :  { %v2160_v46 = vld [vmem:[#allocation7 + $0x20] sm:$0xff]  }
 0x10b   :  { %1045 = vmatpush1.bf16.msra.mxu1 %v1890_v62  ;;  %1088 = vmatpush1.bf16.msra.mxu0 %v1892_v63  ;;  %v231_v62 = vld [vmem:[#allocation5 + $0x358] sm:$0xff] }
 0x10c   :  { %1046 = vmatprep.subr.bf16.mxu1 %v1883_v0  ;;  %1089 = vmatprep.subr.bf16.mxu0 %v1885_v1  ;;  %v235_v63 = vld [vmem:[#allocation5 + $0x378] sm:$0xff]  ;;  %v1954_v0 = vcombine.low %v238_v52, %v242_v53  ;;  %v1956_v1 = vcombine.low %v239_v54, %v243_v55  ;;  %v2167_v52 = vld [vmem:[#allocation7 + $0xd0] sm:$0xff]   ;;  %v2170_v55 = vld [vmem:[#allocation7 + $0x48] sm:$0xff]  }
 0x10d   :  { %v1949_v3 = vcombine.high %v231_v62, %v235_v63  ;;  %v2168_v53 = vld [vmem:[#allocation7 + $0x10] sm:$0xff]  }
 0x10e   :  { %v2169_v54 = vld [vmem:[#allocation7 + $0x90] sm:$0xff]  }
 0x10f   :  { %1047 = vmatpush1.bf16.msra.mxu1 %v1882_v6  ;;  %1090 = vmatpush1.bf16.msra.mxu0 %v1884_v7  ;;  %v223_v6 = vld [vmem:[#allocation5 + $0x318] sm:$0xff] }
 0x110   :  { %1048 = vmatprep.subr.bf16.mxu1 %v1875_v8  ;;  %1091 = vmatprep.subr.bf16.mxu0 %v1877_v9  ;;  %v227_v7 = vld [vmem:[#allocation5 + $0x338] sm:$0xff]  ;;  %v1946_v8 = vcombine.low %v230_v60, %v234_v61  ;;  %v1948_v9 = vcombine.low %v231_v62, %v235_v63  ;;  %v2175_v60 = vld [vmem:[#allocation7 + $0xc0] sm:$0xff]  }
 0x111   :  { %v1941_v11 = vcombine.high %v223_v6, %v227_v7  ;;  %v2176_v61 = vld [vmem:[#allocation7] sm:$0xff]   ;;  %v2178_v63 = vld [vmem:[#allocation7 + $0x178] sm:$0xff]  }
 0x112   :  { %v2177_v62 = vld [vmem:[#allocation7 + $0x80] sm:$0xff]  }
 0x113   :  { %1049 = vmatpush1.bf16.msra.mxu1 %v1874_v14  ;;  %1092 = vmatpush1.bf16.msra.mxu0 %v1876_v15  ;;  %v215_v14 = vld [vmem:[#allocation5 + $0x2d8] sm:$0xff] }
 0x114   :  { %1050 = vmatprep.subr.bf16.mxu1 %v1867_v16  ;;  %1093 = vmatprep.subr.bf16.mxu0 %v1869_v17  ;;  %v219_v15 = vld [vmem:[#allocation5 + $0x2f8] sm:$0xff]  ;;  %v1938_v16 = vcombine.low %v222_v4, %v226_v5  ;;  %v1940_v17 = vcombine.low %v223_v6, %v227_v7 }
 0x115   :  { %v1933_v20 = vcombine.high %v215_v14, %v219_v15 }
 0x117   :  { %1051 = vmatpush1.bf16.msra.mxu1 %v1866_v23  ;;  %1094 = vmatpush1.bf16.msra.mxu0 %v1868_v24  ;;  %v207_v23 = vld [vmem:[#allocation5 + $0x298] sm:$0xff] }
 0x118   :  { %1052 = vmatprep.subr.bf16.mxu1 %v1859_v25  ;;  %1095 = vmatprep.subr.bf16.mxu0 %v1861_v26  ;;  %v211_v24 = vld [vmem:[#allocation5 + $0x2b8] sm:$0xff]  ;;  %v1930_v25 = vcombine.low %v214_v12, %v218_v13  ;;  %v1932_v26 = vcombine.low %v215_v14, %v219_v15 }
 0x119   :  { %v1925_v28 = vcombine.high %v207_v23, %v211_v24  ;;  %v1924_v30 = vcombine.low %v207_v23, %v211_v24 }
 0x11b   :  { %1053 = vmatpush1.bf16.msra.mxu1 %v1858_v31  ;;  %1096 = vmatpush1.bf16.msra.mxu0 %v1860_v32  ;;  %v2146_v31 = vld [vmem:[#allocation7 + $0x78] sm:$0xff]  }
 0x11c   :  { %1054 = vmatprep.subr.bf16.mxu1 %v1979_v33  ;;  %1097 = vmatprep.subr.bf16.mxu0 %v1981_v34  ;;  %v2147_v32 = vld [vmem:[#allocation7 + $0xf8] sm:$0xff]  }
 0x11d   :  { %v2148_v33 = vld [vmem:[#allocation7 + $0x38] sm:$0xff]  }
 0x11e   :  { %v2149_v34 = vld [vmem:[#allocation7 + $0xb8] sm:$0xff]  }
 0x11f   :  { %1055 = vmatpush2.bf16.msra.mxu1 %v1978_v40  ;;  %1098 = vmatpush2.bf16.msra.mxu0 %v1980_v41  ;;  %v2154_v40 = vld [vmem:[#allocation7 + $0x68] sm:$0xff]  }
 0x120   :  { %1056 = vmatprep.subr.bf16.mxu1 %v1971_v42  ;;  %1099 = vmatprep.subr.bf16.mxu0 %v1973_v43  ;;  %v2155_v41 = vld [vmem:[#allocation7 + $0xe8] sm:$0xff]  }
 0x121   :  { %v2156_v42 = vld [vmem:[#allocation7 + $0x28] sm:$0xff]  }
 0x122   :  { %v2157_v43 = vld [vmem:[#allocation7 + $0xa8] sm:$0xff]  }
 0x123   :  { %1057 = vmatpush2.bf16.msra.mxu1 %v1970_v48  ;;  %1100 = vmatpush2.bf16.msra.mxu0 %v1972_v49  ;;  %v2163_v48 = vld [vmem:[#allocation7 + $0xd8] sm:$0xff]  }
 0x124   :  { %1058 = vmatprep.subr.bf16.mxu1 %v1963_v50  ;;  %1101 = vmatprep.subr.bf16.mxu0 %v1965_v51  ;;  %v2164_v49 = vld [vmem:[#allocation7 + $0x18] sm:$0xff]   ;;  %v2166_v51 = vld [vmem:[#allocation7 + $0x50] sm:$0xff]  }
 0x125   :  { %v2165_v50 = vld [vmem:[#allocation7 + $0x98] sm:$0xff]  }
 0x127   :  { %1059 = vmatpush2.bf16.msra.mxu1 %v1962_v56  ;;  %1102 = vmatpush2.bf16.msra.mxu0 %v1964_v57  ;;  %v2171_v56 = vld [vmem:[#allocation7 + $0xc8] sm:$0xff]  }
 0x128   :  { %1060 = vmatprep.subr.bf16.mxu1 %v1955_v58  ;;  %1103 = vmatprep.subr.bf16.mxu0 %v1957_v59  ;;  %v2172_v57 = vld [vmem:[#allocation7 + $0x8] sm:$0xff]   ;;  %v2174_v59 = vld [vmem:[#allocation7 + $0x40] sm:$0xff]  }
 0x129   :  { %v2173_v58 = vld [vmem:[#allocation7 + $0x88] sm:$0xff]  }
 0x12b   :  { %1061 = vmatpush2.bf16.msra.mxu1 %v1954_v0  ;;  %1104 = vmatpush2.bf16.msra.mxu0 %v1956_v1  ;;  %v2179_v0 = vld [vmem:[#allocation7 + $0x1f8] sm:$0xff]   ;;  %v268_v1 = vld [vmem:[#allocation5 + $0x480] sm:$0x11] }
 0x12c   :  { %1062 = vmatprep.subr.bf16.mxu1 %v1947_v2  ;;  %1105 = vmatprep.subr.bf16.mxu0 %v1949_v3  ;;  %v269_v2 = vld [vmem:[#allocation5 + $0x488] sm:$0x11]  ;;  %v273_v3 = vunpack.c.h.bf16 %v268_v1  ;;  %v272_v5 = vunpack.c.l.bf16 %v268_v1 }
 0x12d   :  { %v275_v4 = vunpack.c.h.bf16 %v269_v2  ;;  %v274_v6 = vunpack.c.l.bf16 %v269_v2  ;;  %v2205_v1 = vld [vmem:[#allocation7 + $0x188] sm:$0xff]   ;;  %v2206_v2 = vld [vmem:[#allocation7 + $0x140] sm:$0xff]  }
 0x12f   :  { %1063 = vmatpush2.bf16.msra.mxu1 %v1946_v8  ;;  %1106 = vmatpush2.bf16.msra.mxu0 %v1948_v9  ;;  %v287_v9 = vrot.slane %v273_v3, %v2336_v19  ;;  %v291_v12 = vrot.slane %v274_v6, %v2336_v19  ;;  %v2207_v3 = vld [vmem:[#allocation7 + $0x1c0] sm:$0xff]   ;;  %v270_v6 = vld [vmem:[#allocation5 + $0x490] sm:$0x11] }
 0x130   :  { %1064 = vmatprep.subr.bf16.mxu1 %v1939_v10  ;;  %1107 = vmatprep.subr.bf16.mxu0 %v1941_v11  ;;  %v295_v10 = vrot.slane %v275_v4, %v2336_v19  ;;  %v283_v11 = vrot.slane %v272_v5, %v2336_v19  ;;  %v2208_v4 = vld [vmem:[#allocation7 + $0x100] sm:$0xff]  }
 0x131   :  { %v2209_v5 = vld [vmem:[#allocation7 + $0x180] sm:$0xff]  }
 0x133   :  { %1065 = vmatpush2.bf16.msra.mxu1 %v1938_v16  ;;  %1108 = vmatpush2.bf16.msra.mxu0 %v1940_v17 }
 0x134   :  { %1066 = vmatprep.subr.bf16.mxu1 %v1931_v18  ;;  %1109 = vmatprep.subr.bf16.mxu0 %v1933_v20 }
 0x137   :  { %1067 = vmatpush2.bf16.msra.mxu1 %v1930_v25  ;;  %1110 = vmatpush2.bf16.msra.mxu0 %v1932_v26 }
 0x138   :  { %1068 = vmatprep.subr.bf16.mxu1 %v1923_v27  ;;  %1111 = vmatprep.subr.bf16.mxu0 %v1925_v28 }
 0x13b   :  { %1069 = vmatpush2.bf16.msra.mxu1 %v1922_v29  ;;  %1112 = vmatpush2.bf16.msra.mxu0 %v1924_v30 }
 0x13c   :  { %2046 = vmatprep.subr.bf16.mxu1 %v2146_v31  ;;  %2068 = vmatprep.subr.bf16.mxu0 %v2147_v32 }
 0x13e   :  { %1071 = vmatmul.mubr.bf16.vlgmr.msra.gmra.mxu1 %v2340_v39  ;;  %1114 = vmatmul.mubr.bf16.vlgmr.msra.gmra.mxu0 %v2340_v39  ;;  %v2161_v39 = vld [vmem:[#allocation7 + $0xa0] sm:$0xff]  }
 0x13f   :  { %2047 = vmatpush3.bf16.msra.mxu1 %v2148_v33  ;;  %2069 = vmatpush3.bf16.msra.mxu0 %v2149_v34 }
 0x140   :  { %2048 = vmatprep.subr.bf16.mxu1 %v2150_v35  ;;  %2070 = vmatprep.subr.bf16.mxu0 %v2151_v36 }
 0x143   :  { %2049 = vmatpush3.bf16.msra.mxu1 %v2152_v37  ;;  %2071 = vmatpush3.bf16.msra.mxu0 %v2153_v38  ;;  %v2180_v38 = vld [vmem:[#allocation7 + $0x138] sm:$0xff]  }
 0x144   :  { %2050 = vmatprep.subr.bf16.mxu1 %v2154_v40  ;;  %2072 = vmatprep.subr.bf16.mxu0 %v2155_v41  ;;  %v2181_v40 = vld [vmem:[#allocation7 + $0x1b8] sm:$0xff]  }
 0x147   :  { %2051 = vmatpush3.bf16.msra.mxu1 %v2156_v42  ;;  %2073 = vmatpush3.bf16.msra.mxu0 %v2157_v43  ;;  %v2182_v43 = vld [vmem:[#allocation7 + $0x170] sm:$0xff]  }
 0x148   :  { %2052 = vmatprep.subr.bf16.mxu1 %v2158_v44  ;;  %2074 = vmatprep.subr.bf16.mxu0 %v2159_v45  ;;  %v2183_v44 = vld [vmem:[#allocation7 + $0x1f0] sm:$0xff]  }
 0x149   :  { %v2184_v45 = vld [vmem:[#allocation7 + $0x130] sm:$0xff]  }
 0x14b   :  { %2053 = vmatpush3.bf16.msra.mxu1 %v2160_v46  ;;  %2075 = vmatpush3.bf16.msra.mxu0 %v2161_v39  ;;  %v2185_v46 = vld [vmem:[#allocation7 + $0x1b0] sm:$0xff]   ;;  %v2186_v39 = vld [vmem:[#allocation7 + $0x168] sm:$0xff]  }
 0x14c   :  { %2054 = vmatprep.subr.bf16.mxu1 %v2162_v47  ;;  %2076 = vmatprep.subr.bf16.mxu0 %v2163_v48  ;;  %v2187_v47 = vld [vmem:[#allocation7 + $0x1e8] sm:$0xff]  }
 0x14d   :  { %v2188_v48 = vld [vmem:[#allocation7 + $0x128] sm:$0xff]  }
 0x14f   :  { %2055 = vmatpush3.bf16.msra.mxu1 %v2164_v49  ;;  %2077 = vmatpush3.bf16.msra.mxu0 %v2165_v50  ;;  %v2189_v49 = vld [vmem:[#allocation7 + $0x1a8] sm:$0xff]   ;;  %v2190_v50 = vld [vmem:[#allocation7 + $0x160] sm:$0xff]  }
 0x150   :  { %2056 = vmatprep.subr.bf16.mxu1 %v2166_v51  ;;  %2078 = vmatprep.subr.bf16.mxu0 %v2167_v52  ;;  %v2191_v51 = vld [vmem:[#allocation7 + $0x1e0] sm:$0xff]  }
 0x151   :  { %v2192_v52 = vld [vmem:[#allocation7 + $0x120] sm:$0xff]  }
 0x153   :  { %2057 = vmatpush3.bf16.msra.mxu1 %v2168_v53  ;;  %2079 = vmatpush3.bf16.msra.mxu0 %v2169_v54  ;;  %v2193_v53 = vld [vmem:[#allocation7 + $0x1a0] sm:$0xff]   ;;  %v2194_v54 = vld [vmem:[#allocation7 + $0x158] sm:$0xff]  }
 0x154   :  { %2058 = vmatprep.subr.bf16.mxu1 %v2170_v55  ;;  %2080 = vmatprep.subr.bf16.mxu0 %v2171_v56  ;;  %v2195_v55 = vld [vmem:[#allocation7 + $0x1d8] sm:$0xff]  }
 0x155   :  { %v2196_v56 = vld [vmem:[#allocation7 + $0x118] sm:$0xff]  }
 0x157   :  { %2059 = vmatpush3.bf16.msra.mxu1 %v2172_v57  ;;  %2081 = vmatpush3.bf16.msra.mxu0 %v2173_v58  ;;  %v2197_v57 = vld [vmem:[#allocation7 + $0x198] sm:$0xff]   ;;  %v2198_v58 = vld [vmem:[#allocation7 + $0x150] sm:$0xff]  }
 0x158   :  { %2060 = vmatprep.subr.bf16.mxu1 %v2174_v59  ;;  %2082 = vmatprep.subr.bf16.mxu0 %v2175_v60  ;;  %v2199_v59 = vld [vmem:[#allocation7 + $0x1d0] sm:$0xff]  }
 0x159   :  { %v2200_v60 = vld [vmem:[#allocation7 + $0x110] sm:$0xff]  }
 0x15b   :  { %2061 = vmatpush3.bf16.msra.mxu1 %v2176_v61  ;;  %2083 = vmatpush3.bf16.msra.mxu0 %v2177_v62  ;;  %v2201_v61 = vld [vmem:[#allocation7 + $0x190] sm:$0xff]   ;;  %v2202_v62 = vld [vmem:[#allocation7 + $0x148] sm:$0xff]  }
 0x15c   :  { %2090 = vmatprep.subr.bf16.mxu1 %v2178_v63  ;;  %2112 = vmatprep.subr.bf16.mxu0 %v2179_v0  ;;  %v2203_v63 = vld [vmem:[#allocation7 + $0x1c8] sm:$0xff]  }
 0x15d   :  { %v2204_v0 = vld [vmem:[#allocation7 + $0x108] sm:$0xff]  }
 0x1be   :  { %v986_v7 = vpop.f32.mrf.mxu1  ;;  %v1029_v8 = vpop.f32.mrf.mxu0 }
 0x1bf   :  { %v987_v22 = vadd.f32 %v986_v7, %v283_v11  ;;  %v1030_v23 = vadd.f32 %v1029_v8, %v291_v12  ;;  %v271_v7 = vld [vmem:[#allocation5 + $0x498] sm:$0x11]  ;;  %v277_v8 = vunpack.c.h.bf16 %v270_v6 }
 0x1c0   :  { %v988_v13 = vpop.f32.mrf.mxu1  ;;  %v1031_v14 = vpop.f32.mrf.mxu0 }
 0x1c1   :  { %v989_v17 = vadd.f32 %v988_v13, %v287_v9  ;;  %v1032_v18 = vadd.f32 %v1031_v14, %v295_v10  ;;  %v1124_v34 = vmax.f32 %v987_v22, 0.0  ;;  %v1126_v35 = vmax.f32 %v1030_v23, 0.0 }
 0x1c2   :  { %v990_v15 = vpop.f32.mrf.mxu1  ;;  %v1033_v16 = vpop.f32.mrf.mxu0  ;;  %v303_v14 = vrot.slane %v277_v8, %v2336_v19 }
 0x1c3   :  { %v991_v20 = vadd.f32 %v990_v15, %v283_v11  ;;  %v1034_v21 = vadd.f32 %v1033_v16, %v291_v12  ;;  %v1125_v30 = vmax.f32 %v989_v17, 0.0  ;;  %v1127_v31 = vmax.f32 %v1032_v18, 0.0 }
 0x1c4   :  { %v992_v24 = vpop.f32.mrf.mxu1  ;;  %v1035_v25 = vpop.f32.mrf.mxu0  ;;  %v278_v11 = vunpack.c.l.bf16 %v271_v7 }
 0x1c5   :  { %v993_v26 = vadd.f32 %v992_v24, %v287_v9  ;;  %v1036_v27 = vadd.f32 %v1035_v25, %v295_v10  ;;  %v1132_v28 = vmax.f32 %v991_v20, 0.0  ;;  %v1134_v29 = vmax.f32 %v1034_v21, 0.0 }
 0x1c6   :  { %v279_v9 = vunpack.c.h.bf16 %v271_v7  ;;  %v276_v10 = vunpack.c.l.bf16 %v270_v6  ;;  %v307_v17 = vrot.slane %v278_v11, %v2336_v19 }
 0x1c7   :  { %v1133_v32 = vmax.f32 %v993_v26, 0.0  ;;  %v1135_v33 = vmax.f32 %v1036_v27, 0.0  ;;  %v1140_v41 = vpack.c.bf16 %v1132_v28, %v1124_v34  ;;  %v1142_v42 = vpack.c.bf16 %v1134_v29, %v1126_v35 }
 0x1c8   :  { %v311_v15 = vrot.slane %v279_v9, %v2336_v19  ;;  %v299_v16 = vrot.slane %v276_v10, %v2336_v19 }
 0x1c9   :  { %v1141_v36 = vpack.c.bf16 %v1133_v32, %v1125_v30  ;;  %v1143_v37 = vpack.c.bf16 %v1135_v33, %v1127_v31 }
 0x1cb   :  { %1698 = vmatprep.mubr.bf16.mxu1 %v1141_v36  ;;  %1739 = vmatprep.mubr.bf16.mxu0 %v1143_v37 }
 0x1cc   :  { %1699 = vmatmul.mubr.bf16.vlgmr.msra.gmra.mxu1 %v1140_v41  ;;  %1740 = vmatmul.mubr.bf16.vlgmr.msra.gmra.mxu0 %v1142_v42 }
 0x1cd   :  { %2091 = vmatpush3.bf16.msra.mxu1 %v2180_v38  ;;  %2113 = vmatpush3.bf16.msra.mxu0 %v2181_v40 }
 0x1ce   :  { %2092 = vmatprep.subr.bf16.mxu1 %v2182_v43  ;;  %2114 = vmatprep.subr.bf16.mxu0 %v2183_v44 }
 0x1d1   :  { %2093 = vmatpush3.bf16.msra.mxu1 %v2184_v45  ;;  %2115 = vmatpush3.bf16.msra.mxu0 %v2185_v46 }
 0x1d2   :  { %2094 = vmatprep.subr.bf16.mxu1 %v2186_v39  ;;  %2116 = vmatprep.subr.bf16.mxu0 %v2187_v47  ;;  %v1276_v47 = vld [vmem:[#allocation7 + $0x200] sm:$0x1] }
 0x1d5   :  { %2095 = vmatpush3.bf16.msra.mxu1 %v2188_v48  ;;  %2117 = vmatpush3.bf16.msra.mxu0 %v2189_v49 }
 0x1d6   :  { %2096 = vmatprep.subr.bf16.mxu1 %v2190_v50  ;;  %2118 = vmatprep.subr.bf16.mxu0 %v2191_v51  ;;  %v1277_v50 = vunpack.c.l.bf16 %v1276_v47 }
 0x1d9   :  { %2097 = vmatpush3.bf16.msra.mxu1 %v2192_v52  ;;  %2119 = vmatpush3.bf16.msra.mxu0 %v2193_v53  ;;  %v1281_v53 = vrot.slane %v1277_v50, %v2336_v19 }
 0x1da   :  { %2098 = vmatprep.subr.bf16.mxu1 %v2194_v54  ;;  %2120 = vmatprep.subr.bf16.mxu0 %v2195_v55 }
 0x1dd   :  { %2099 = vmatpush3.bf16.msra.mxu1 %v2196_v56  ;;  %2121 = vmatpush3.bf16.msra.mxu0 %v2197_v57 }
 0x1de   :  { %2100 = vmatprep.subr.bf16.mxu1 %v2198_v58  ;;  %2122 = vmatprep.subr.bf16.mxu0 %v2199_v59 }
 0x1e1   :  { %2101 = vmatpush3.bf16.msra.mxu1 %v2200_v60  ;;  %2123 = vmatpush3.bf16.msra.mxu0 %v2201_v61 }
 0x1e2   :  { %2102 = vmatprep.subr.bf16.mxu1 %v2202_v62  ;;  %2124 = vmatprep.subr.bf16.mxu0 %v2203_v63 }
 0x1e5   :  { %2103 = vmatpush3.bf16.msra.mxu1 %v2204_v0  ;;  %2125 = vmatpush3.bf16.msra.mxu0 %v2205_v1 }
 0x1e6   :  { %2104 = vmatprep.subr.bf16.mxu1 %v2206_v2  ;;  %2126 = vmatprep.subr.bf16.mxu0 %v2207_v3 }
 0x1e9   :  { %2105 = vmatpush3.bf16.msra.mxu1 %v2208_v4  ;;  %2127 = vmatpush3.bf16.msra.mxu0 %v2209_v5 }
 0x1fe   :  { %v1072_v12 = vpop.f32.mrf.mxu1  ;;  %v1115_v13 = vpop.f32.mrf.mxu0 }
 0x1ff   :  { %v1073_v27 = vadd.f32 %v1072_v12, %v299_v16  ;;  %v1116_v28 = vadd.f32 %v1115_v13, %v307_v17 }
 0x200   :  { %v1074_v18 = vpop.f32.mrf.mxu1  ;;  %v1117_v20 = vpop.f32.mrf.mxu0 }
 0x201   :  { %v1075_v23 = vadd.f32 %v1074_v18, %v303_v14  ;;  %v1118_v24 = vadd.f32 %v1117_v20, %v311_v15  ;;  %v1128_v40 = vmax.f32 %v1073_v27, 0.0  ;;  %v1130_v41 = vmax.f32 %v1116_v28, 0.0 }
 0x202   :  { %v1076_v21 = vpop.f32.mrf.mxu1  ;;  %v1119_v22 = vpop.f32.mrf.mxu0 }
 0x203   :  { %v1077_v25 = vadd.f32 %v1076_v21, %v299_v16  ;;  %v1120_v26 = vadd.f32 %v1119_v22, %v307_v17  ;;  %v1129_v35 = vmax.f32 %v1075_v23, 0.0  ;;  %v1131_v36 = vmax.f32 %v1118_v24, 0.0 }
 0x204   :  { %v1078_v29 = vpop.f32.mrf.mxu1  ;;  %v1121_v30 = vpop.f32.mrf.mxu0 }
 0x205   :  { %v1079_v31 = vadd.f32 %v1078_v29, %v303_v14  ;;  %v1122_v32 = vadd.f32 %v1121_v30, %v311_v15  ;;  %v1136_v33 = vmax.f32 %v1077_v25, 0.0  ;;  %v1138_v34 = vmax.f32 %v1120_v26, 0.0 }
 0x207   :  { %v1137_v37 = vmax.f32 %v1079_v31, 0.0  ;;  %v1139_v38 = vmax.f32 %v1122_v32, 0.0  ;;  %v1144_v44 = vpack.c.bf16 %v1136_v33, %v1128_v40  ;;  %v1146_v45 = vpack.c.bf16 %v1138_v34, %v1130_v41 }
 0x209   :  { %v1145_v42 = vpack.c.bf16 %v1137_v37, %v1129_v35  ;;  %v1147_v43 = vpack.c.bf16 %v1139_v38, %v1131_v36 }
 0x20b   :  { %1780 = vmatprep.mubr.bf16.mxu1 %v1145_v42  ;;  %1821 = vmatprep.mubr.bf16.mxu0 %v1147_v43 }
 0x20c   :  { %1781 = vmatmul.mubr.bf16.vlgmr.msra.gmra.mxu1 %v1144_v44  ;;  %1822 = vmatmul.mubr.bf16.vlgmr.msra.gmra.mxu0 %v1146_v45 }
 0x28c   :  { %v2062_v46 = vpop.f32.mrf.mxu1  ;;  %v2084_v39 = vpop.f32.mrf.mxu0 }
 0x28e   :  { %v2063_v48 = vpop.f32.mrf.mxu1  ;;  %v2085_v49 = vpop.f32.mrf.mxu0 }
 0x28f   :  { %v2064_v54 = vadd.f32 %v2063_v48, %v2062_v46  ;;  %v2086_v61 = vadd.f32 %v2085_v49, %v2084_v39 }
 0x290   :  { %v2065_v51 = vpop.f32.mrf.mxu1  ;;  %v2087_v52 = vpop.f32.mrf.mxu0 }
 0x291   :  { %v1701_v57 = vadd.f32 %v2064_v54, %v1281_v53 }
 0x292   :  { %v2066_v55 = vpop.f32.mrf.mxu1  ;;  %v2088_v56 = vpop.f32.mrf.mxu0 }
 0x293   :  { %v2067_v58 = vadd.f32 %v2066_v55, %v2065_v51  ;;  %v1742_v0 = vadd.f32 %v2086_v61, %v1701_v57  ;;  %v2089_v5 = vadd.f32 %v2088_v56, %v2087_v52 }
 0x295   :  { %v1704_v1 = vadd.f32 %v2067_v58, %v1281_v53 }
 0x297   :  { %v1745_v9 = vadd.f32 %v2089_v5, %v1704_v1 }
 0x2cc   :  { %v2106_v59 = vpop.f32.mrf.mxu1  ;;  %v2128_v60 = vpop.f32.mrf.mxu0 }
 0x2ce   :  { %v2107_v62 = vpop.f32.mrf.mxu1  ;;  %v2129_v63 = vpop.f32.mrf.mxu0 }
 0x2cf   :  { %v2108_v2 = vadd.f32 %v2107_v62, %v2106_v59  ;;  %v2130_v7 = vadd.f32 %v2129_v63, %v2128_v60 }
 0x2d0   :  { %v2109_v3 = vpop.f32.mrf.mxu1  ;;  %v2131_v4 = vpop.f32.mrf.mxu0 }
 0x2d1   :  { %v1783_v6 = vadd.f32 %v2108_v2, %v1742_v0 }
 0x2d2   :  { %v2110_v8 = vpop.f32.mrf.mxu1  ;;  %v2132_v19 = vpop.f32.mrf.mxu0 }
 0x2d3   :  { %v1824_v10 = vadd.f32 %v2130_v7, %v1783_v6  ;;  %v2111_v11 = vadd.f32 %v2110_v8, %v2109_v3  ;;  %v2133_v13 = vadd.f32 %v2132_v19, %v2131_v4 }
 0x2d5   :  { %1830 = vst [vmem:[#allocation8] sm:$0xff] %v1824_v10  ;;  %v1786_v12 = vadd.f32 %v2111_v11, %v1745_v9 }
 0x2d7   :  { %v1827_v14 = vadd.f32 %v2133_v13, %v1786_v12 }
 0x2d9   :  { %1831 = vst [vmem:[#allocation8 + $0x8] sm:$0xff] %v1827_v14 }
 0x2da   :  { %2281 = shalt.err (!%p2278_p5)
}
 0x2db   :  { %s2305_s4 = smov 128   ;;  %s2306_s5 = smov 8  }
 0x2dc   :  { %1843 = dma.vmem_to_hbm [thread:$0]  %s1838_s2, 256, %s2361_s3, [#allocation4], %s2305_s4, %s2305_s4, %s2306_s5  }
 0x2dd   :  { %2294 = dma.done.wait [#allocation4], 256  }
 0x2de   :  { %2295 = vsyncadd [#allocation4], 4294967040 }
 0x2df   :  { %1847 = vsyncpa [#allocation3], 1 }
 0x2e0   :  { %1848 = vsyncpa [#allocation6], 1 }
 0x2e1   :  { %1849 = vsyncpa [#allocation4], 1 }

</bundles_post_ra>
